<compile_context>
chip_gen: v7x
topology: tpu7x:2x2x1
jax: 0.10.0
libtpu: 0.0.40
codegen_flags: <defaults>
</compile_context>

<pallas_src>
import functools

import jax
import jax.numpy as jnp
from jax.experimental import pallas as pl
from jax.experimental.pallas import tpu as pltpu


def _round_up(n: int, m: int) -> int:
    return ((n + m - 1) // m) * m


def mlp_kernel(x_ref, w1_ref, w2_ref, w3_ref, b_ref, o_ref, *, h1p, h2p, dop):
    cdtype = w1_ref.dtype
    # fc1 + ReLU  (bf16 MXU inputs, fp32 accumulation, fp32 bias/ReLU epilogue -- v5e-safe)
    h1 = jnp.dot(x_ref[...], w1_ref[...], preferred_element_type=jnp.float32)
    h1 = jnp.maximum(h1 + b_ref[0:1, :h1p], 0.0)
    # fc2 + ReLU
    h2 = jnp.dot(h1.astype(cdtype), w2_ref[...], preferred_element_type=jnp.float32)
    h2 = jnp.maximum(h2 + b_ref[1:2, :h2p], 0.0)
    # fc3 (raw logits)
    out = jnp.dot(h2.astype(cdtype), w3_ref[...], preferred_element_type=jnp.float32)
    out = out + b_ref[2:3, :dop]
    o_ref[...] = out.astype(o_ref.dtype)


def prepare_params(params, *, compute_dtype=jnp.bfloat16):
    """Pad + cast the weights once (call OUTSIDE the per-step hot path).

    Zero padding keeps the padded lanes exactly zero through bias-add/ReLU, so results are
    unaffected and simply sliced off in the wrapper.
    """
    w1, b1, w2, b2, w3, b3 = params
    D_in, H1 = w1.shape
    H2 = w2.shape[1]
    D_out = w3.shape[1]
    D_in_p, H1_p, H2_p, D_out_p = (_round_up(d, 128) for d in (D_in, H1, H2, D_out))
    W_max = max(H1_p, H2_p, D_out_p)

    w1p = jnp.zeros((D_in_p, H1_p), compute_dtype).at[:D_in, :H1].set(w1.astype(compute_dtype))
    w2p = jnp.zeros((H1_p, H2_p), compute_dtype).at[:H1, :H2].set(w2.astype(compute_dtype))
    w3p = jnp.zeros((H2_p, D_out_p), compute_dtype).at[:H2, :D_out].set(w3.astype(compute_dtype))

    # Pack the three fp32 biases into one sublane-aligned (8, W_max) buffer: rows 0/1/2.
    bpack = jnp.zeros((8, W_max), jnp.float32)
    bpack = bpack.at[0, :H1].set(b1.reshape(-1))
    bpack = bpack.at[1, :H2].set(b2.reshape(-1))
    bpack = bpack.at[2, :D_out].set(b3.reshape(-1))

    meta = {
        "dims": (D_in, H1, H2, D_out),
        "padded": (D_in_p, H1_p, H2_p, D_out_p),
        "compute_dtype": compute_dtype,
    }
    return (w1p, w2p, w3p, bpack), meta


def net_forward(x, prepared, *, meta, tile_b: int = 256, out_dtype=jnp.float32):
    """Fused MLP forward. x: (batch, input_dim) fp32. Returns (batch, output_dim) out_dtype."""
    w1p, w2p, w3p, bpack = prepared
    D_in, H1, H2, D_out = meta["dims"]
    D_in_p, H1_p, H2_p, D_out_p = meta["padded"]
    cdtype = meta["compute_dtype"]
    W_max = bpack.shape[1]
    B = x.shape[0]

    # --- Batch tile selection -------------------------------------------------------------
    w_itemsize = jnp.dtype(cdtype).itemsize
    sub = 16 if w_itemsize == 2 else 8          # full sublane packing for bf16 vregs
    B_sub = _round_up(B, sub)
    tb = _round_up(min(tile_b, B_sub), sub)
    # v7x megacore: keep >= 2 grid steps whenever the batch permits, so the "parallel" batch
    # axis can be sharded across both TensorCores instead of idling one.
    if B_sub >= 2 * sub and B_sub // tb < 2:
        tb = _round_up((B_sub + 1) // 2, sub)
    B_p = _round_up(B, tb)

    # --- Per-call input prep: only x (weights are already padded/cast) ---------------------
    if B_p == B and D_in_p == D_in:
        xp = x.astype(cdtype)                   # already aligned: cast only, no pad copy
    else:
        xp = jnp.zeros((B_p, D_in_p), cdtype).at[:B, :D_in].set(x.astype(cdtype))

    # --- VMEM budget (single-buffered weights + double-buffered streams + fp32 temps) ------
    out_itemsize = jnp.dtype(out_dtype).itemsize
    weight_bytes = (w1p.size + w2p.size + w3p.size) * w_itemsize
    bias_bytes = bpack.size * 4
    stream_bytes = 2 * tb * D_in_p * w_itemsize + 2 * tb * D_out_p * out_itemsize
    temp_bytes = tb * (H1_p + H2_p) * 4
    vmem_limit = int(1.5 * (weight_bytes + bias_bytes + stream_bytes + temp_bytes)) + (2 << 20)
    vmem_limit = min(max(vmem_limit, 16 << 20), 64 << 20)

    cost = pl.CostEstimate(
        flops=2 * B_p * (D_in_p * H1_p + H1_p * H2_p + H2_p * D_out_p),
        transcendentals=0,
        bytes_accessed=(
            xp.size * w_itemsize + weight_bytes + bias_bytes + B_p * D_out_p * out_itemsize
        ),
    )

    kernel = functools.partial(mlp_kernel, h1p=H1_p, h2p=H2_p, dop=D_out_p)

    out_p = pl.pallas_call(
        kernel,
        out_shape=jax.ShapeDtypeStruct((B_p, D_out_p), out_dtype),
        grid_spec=pltpu.PrefetchScalarGridSpec(
            num_scalar_prefetch=0,
            grid=(B_p // tb,),
            in_specs=[
                # streamed per batch tile (double-buffered by default)
                pl.BlockSpec((tb, D_in_p), lambda i: (i, 0)),
                # grid-invariant, VMEM-resident, single-buffered weights + packed biases
                pl.BlockSpec((D_in_p, H1_p), lambda i: (0, 0), pipeline_mode=pl.Buffered(1)),
                pl.BlockSpec((H1_p, H2_p), lambda i: (0, 0), pipeline_mode=pl.Buffered(1)),
                pl.BlockSpec((H2_p, D_out_p), lambda i: (0, 0), pipeline_mode=pl.Buffered(1)),
                pl.BlockSpec((8, W_max), lambda i: (0, 0), pipeline_mode=pl.Buffered(1)),
            ],
            out_specs=pl.BlockSpec((tb, D_out_p), lambda i: (i, 0)),
        ),
        compiler_params=pltpu.CompilerParams(
            dimension_semantics=("parallel",),
            vmem_limit_bytes=vmem_limit,
        ),
        cost_estimate=cost,
    )(xp, w1p, w2p, w3p, bpack)

    return out_p[:B, :D_out]


def init_params(key, input_dim, hidden_dim1, hidden_dim2, output_dim):
    """Deterministic init mirroring nn.Linear's U(-1/sqrt(fan_in), 1/sqrt(fan_in))."""
    ks = jax.random.split(key, 6)

    def linear(kw, kb, fan_in, fan_out):
        bound = 1.0 / jnp.sqrt(fan_in)
        w = jax.random.uniform(kw, (fan_in, fan_out), jnp.float32, -bound, bound)
        b = jax.random.uniform(kb, (1, fan_out), jnp.float32, -bound, bound)
        return w, b

    w1, b1 = linear(ks[0], ks[1], input_dim, hidden_dim1)
    w2, b2 = linear(ks[2], ks[3], hidden_dim1, hidden_dim2)
    w3, b3 = linear(ks[4], ks[5], hidden_dim2, output_dim)
    return (w1, b1, w2, b2, w3, b3)


if __name__ == "__main__":
    batch, input_dim, hidden_dim1, hidden_dim2, output_dim = 8, 32, 64, 64, 16

    key = jax.random.PRNGKey(0)
    kx, kp = jax.random.split(key)
    x = jax.random.normal(kx, (batch, input_dim), jnp.float32)
    params = init_params(kp, input_dim, hidden_dim1, hidden_dim2, output_dim)

    # Pad + cast the weights ONCE, outside the jit'd hot path.
    prepared, meta = prepare_params(params)
    fwd = jax.jit(functools.partial(net_forward, meta=meta))

    out = fwd(x, prepared)
    jax.block_until_ready(out)

    # Reference in plain JAX with the same bf16-input / fp32-accumulate semantics.
    w1, b1, w2, b2, w3, b3 = params
    f32 = lambda a: a.astype(jnp.bfloat16).astype(jnp.float32)
    ref = jnp.maximum(f32(x) @ f32(w1) + b1, 0.0)
    ref = jnp.maximum(f32(ref) @ f32(w2) + b2, 0.0)
    ref = f32(ref) @ f32(w3) + b3

    assert out.shape == (batch, output_dim)
    assert jnp.allclose(out, ref, atol=1e-4, rtol=1e-4), float(jnp.max(jnp.abs(out - ref)))

    print("KERNEL_OK")
</pallas_src>

<mosaic_0001>
module attributes {stable_mosaic.version = 11 : i64} {
  func.func @mlp_kernel(%arg0: i32, %arg1: memref<16x128xbf16, #tpu.memory_space<vmem>>, %arg2: memref<128x128xbf16, #tpu.memory_space<vmem>>, %arg3: memref<128x128xbf16, #tpu.memory_space<vmem>>, %arg4: memref<128x128xbf16, #tpu.memory_space<vmem>>, %arg5: memref<8x128xf32, #tpu.memory_space<vmem>>, %arg6: memref<16x128xf32, #tpu.memory_space<vmem>>) attributes {dimension_semantics = [#tpu.dimension_semantics<parallel>], iteration_bounds = array<i64: 1>, scalar_prefetch = 0 : i64, scratch_operands = 0 : i64, tpu.core_type = #tpu.core_type<tc>, window_params = [{transform_indices = @transform_0, window_bounds = array<i64: 16, 128>}, {pipeline_mode = #tpu.pipeline_mode<synchronous>, transform_indices = @transform_1, window_bounds = array<i64: 128, 128>}, {pipeline_mode = #tpu.pipeline_mode<synchronous>, transform_indices = @transform_2, window_bounds = array<i64: 128, 128>}, {pipeline_mode = #tpu.pipeline_mode<synchronous>, transform_indices = @transform_3, window_bounds = array<i64: 128, 128>}, {pipeline_mode = #tpu.pipeline_mode<synchronous>, transform_indices = @transform_4, window_bounds = array<i64: 8, 128>}, {transform_indices = @transform_5, window_bounds = array<i64: 16, 128>}]} {
    %c0 = arith.constant 0 : index
    %c0_0 = arith.constant 0 : index
    %0 = vector.load %arg1[%c0, %c0_0] : memref<16x128xbf16, #tpu.memory_space<vmem>>, vector<16x128xbf16>
    %c0_1 = arith.constant 0 : index
    %c0_2 = arith.constant 0 : index
    %1 = vector.load %arg2[%c0_1, %c0_2] : memref<128x128xbf16, #tpu.memory_space<vmem>>, vector<128x128xbf16>
    %cst = arith.constant dense<0.000000e+00> : vector<16x128xf32>
    %2 = tpu.matmul %0, %1, %cst {dimension_numbers = #tpu.dot_dimension_numbers<[1], [0], [0], [1], [0, 0, 1, 1], [], []>} : vector<16x128xbf16>, vector<128x128xbf16>, vector<16x128xf32> -> vector<16x128xf32>
    %c0_3 = arith.constant 0 : index
    %c0_4 = arith.constant 0 : index
    %3 = vector.load %arg5[%c0_3, %c0_4] : memref<8x128xf32, #tpu.memory_space<vmem>>, vector<1x128xf32>
    %4 = vector.broadcast %3 : vector<1x128xf32> to vector<16x128xf32>
    %5 = arith.addf %2, %4 : vector<16x128xf32>
    %cst_5 = arith.constant 0.000000e+00 : f32
    %6 = vector.broadcast %cst_5 : f32 to vector<16x128xf32>
    %7 = arith.maximumf %5, %6 : vector<16x128xf32>
    %8 = arith.truncf %7 : vector<16x128xf32> to vector<16x128xbf16>
    %c0_6 = arith.constant 0 : index
    %c0_7 = arith.constant 0 : index
    %9 = vector.load %arg3[%c0_6, %c0_7] : memref<128x128xbf16, #tpu.memory_space<vmem>>, vector<128x128xbf16>
    %cst_8 = arith.constant dense<0.000000e+00> : vector<16x128xf32>
    %10 = tpu.matmul %8, %9, %cst_8 {dimension_numbers = #tpu.dot_dimension_numbers<[1], [0], [0], [1], [0, 0, 1, 1], [], []>} : vector<16x128xbf16>, vector<128x128xbf16>, vector<16x128xf32> -> vector<16x128xf32>
    %c1 = arith.constant 1 : index
    %c0_9 = arith.constant 0 : index
    %11 = vector.load %arg5[%c1, %c0_9] : memref<8x128xf32, #tpu.memory_space<vmem>>, vector<1x128xf32>
    %12 = vector.broadcast %11 : vector<1x128xf32> to vector<16x128xf32>
    %13 = arith.addf %10, %12 : vector<16x128xf32>
    %cst_10 = arith.constant 0.000000e+00 : f32
    %14 = vector.broadcast %cst_10 : f32 to vector<16x128xf32>
    %15 = arith.maximumf %13, %14 : vector<16x128xf32>
    %16 = arith.truncf %15 : vector<16x128xf32> to vector<16x128xbf16>
    %c0_11 = arith.constant 0 : index
    %c0_12 = arith.constant 0 : index
    %17 = vector.load %arg4[%c0_11, %c0_12] : memref<128x128xbf16, #tpu.memory_space<vmem>>, vector<128x128xbf16>
    %cst_13 = arith.constant dense<0.000000e+00> : vector<16x128xf32>
    %18 = tpu.matmul %16, %17, %cst_13 {dimension_numbers = #tpu.dot_dimension_numbers<[1], [0], [0], [1], [0, 0, 1, 1], [], []>} : vector<16x128xbf16>, vector<128x128xbf16>, vector<16x128xf32> -> vector<16x128xf32>
    %c2 = arith.constant 2 : index
    %c0_14 = arith.constant 0 : index
    %19 = vector.load %arg5[%c2, %c0_14] : memref<8x128xf32, #tpu.memory_space<vmem>>, vector<1x128xf32>
    %20 = vector.broadcast %19 : vector<1x128xf32> to vector<16x128xf32>
    %21 = arith.addf %18, %20 : vector<16x128xf32>
    %c0_15 = arith.constant 0 : index
    %c0_16 = arith.constant 0 : index
    %22 = vector.load %arg6[%c0_15, %c0_16] : memref<16x128xf32, #tpu.memory_space<vmem>>, vector<16x128xf32>
    tpu.vector_store %arg6[%c0_15, %c0_16], %21 {strides = array<i32>} : memref<16x128xf32, #tpu.memory_space<vmem>>, vector<16x128xf32>,
    return
  }
  func.func @transform_0(%arg0: i32) -> (i32, i32) {
    %c0_i32 = arith.constant 0 : i32
    %c0_i32_0 = arith.constant 0 : i32
    return %arg0, %c0_i32 : i32, i32
  }
  func.func @transform_1(%arg0: i32) -> (i32, i32) {
    %c0_i32 = arith.constant 0 : i32
    %c0_i32_0 = arith.constant 0 : i32
    %c0_i32_1 = arith.constant 0 : i32
    return %c0_i32, %c0_i32_0 : i32, i32
  }
  func.func @transform_2(%arg0: i32) -> (i32, i32) {
    %c0_i32 = arith.constant 0 : i32
    %c0_i32_0 = arith.constant 0 : i32
    %c0_i32_1 = arith.constant 0 : i32
    return %c0_i32, %c0_i32_0 : i32, i32
  }
  func.func @transform_3(%arg0: i32) -> (i32, i32) {
    %c0_i32 = arith.constant 0 : i32
    %c0_i32_0 = arith.constant 0 : i32
    %c0_i32_1 = arith.constant 0 : i32
    return %c0_i32, %c0_i32_0 : i32, i32
  }
  func.func @transform_4(%arg0: i32) -> (i32, i32) {
    %c0_i32 = arith.constant 0 : i32
    %c0_i32_0 = arith.constant 0 : i32
    %c0_i32_1 = arith.constant 0 : i32
    return %c0_i32, %c0_i32_0 : i32, i32
  }
  func.func @transform_5(%arg0: i32) -> (i32, i32) {
    %c0_i32 = arith.constant 0 : i32
    %c0_i32_0 = arith.constant 0 : i32
    return %arg0, %c0_i32 : i32, i32
  }
}

</mosaic_0001>

<bundles_post_ra>
// kernel: net_forward.1
= control target key start
LH: loop header
LB: loop body
LE: loop exit
PB: predicated region body
PF: predicated region fallthrough
CT: control target
= control target key end

     0   :  { %10 = vsyncpa [#allocation3], 0  ;;  %s768_s0 = inlined_call_operand.vmem [shape: bf16[16,128], index: 0, kind: input, shape index: {}]   ;;  %s769_s1 = inlined_call_operand.hbm [shape: bf16[128,128], index: 1, kind: input, shape index: {}]   ;;  %s770_s2 = inlined_call_operand.hbm [shape: bf16[128,128], index: 2, kind: input, shape index: {}]   ;;  %s771_s3 = inlined_call_operand.hbm [shape: bf16[128,128], index: 3, kind: input, shape index: {}]   ;;  %s772_s4 = inlined_call_operand.vmem [shape: f32[8,128], index: 4, kind: input, shape index: {}]   ;;  %s773_s5 = inlined_call_operand.vmem [shape: f32[16,128], index: 5, kind: output, shape index: {}]  }
   0x1   :  { %11 = vsyncpa [#allocation5], 0  ;;  %s631_s18 = smov [#allocation4]   ;;  %s632_s20 = smov [#allocation2]  }
   0x2   :  { %s31_s19 = sshll.u32 %s631_s18, 4  ;;  %s19_s21 = sshll.u32 %s632_s20, 4  ;;  %s32_s19 = int_to_ptr.vmem [resolvable:$true] %s31_s19  ;;  %s668_s21 = int_to_ptr.vmem [resolvable:$true] %s19_s21 }
   0x3   :  { %s561_s24 = scalar_lea.hbm %s770_s2, 1024 }
   0x4   :  { %p562_p0 = scmp.ne.s32.totalorder %s770_s2, %s561_s24  ;;  %p565_p1 = scmp.lt.u32.totalorder %s561_s24, %s770_s2 }
   0x6   :  { %p567_p2 = pnand %p565_p1, %p562_p0 }
   0x8   :  { %570 = shalt.err (!%p567_p2)
}
   0x9   :  { %s571_s29 = scalar_lea.vmem %s32_s19, 1024  ;;  %p576_p4 = scmp.lt.s32.totalorder %s32_s19, %s32_s19 }
   0xa   :  { %p572_p3 = scmp.ne.s32.totalorder %s32_s19, %s571_s29  ;;  %p577_p5 = scmp.lt.s32.totalorder %s571_s29, %s571_s29 }
   0xc   :  { %p578_p6 = por %p577_p5, %p576_p4 }
   0xe   :  { %p579_p7 = pnand %p578_p6, %p572_p3 }
  0x10   :  { %582 = shalt.err (!%p579_p7)
}
  0x11   :  { %s633_s30 = smov 64   ;;  %s634_s6 = smov 4  }
  0x12   :  { %37 = dma.hbm_to_vmem [thread:$0]  %s770_s2, 1024, %s32_s19, [#allocation5], %s633_s30, %s633_s30, %s634_s6  }
  0x13   :  { %s583_s11 = scalar_lea.hbm %s769_s1, 1024 }
  0x14   :  { %p584_p8 = scmp.ne.s32.totalorder %s769_s1, %s583_s11  ;;  %p587_p9 = scmp.lt.u32.totalorder %s583_s11, %s769_s1 }
  0x16   :  { %p589_p10 = pnand %p587_p9, %p584_p8 }
  0x18   :  { %592 = shalt.err (!%p589_p10)
}
  0x19   :  { %s593_s16 = scalar_lea.vmem %s668_s21, 1024  ;;  %p598_p12 = scmp.lt.s32.totalorder %s668_s21, %s668_s21 }
  0x1a   :  { %p594_p11 = scmp.ne.s32.totalorder %s668_s21, %s593_s16  ;;  %p599_p13 = scmp.lt.s32.totalorder %s593_s16, %s593_s16 }
  0x1c   :  { %p600_p0 = por %p599_p13, %p598_p12 }
  0x1e   :  { %p601_p1 = pnand %p600_p0, %p594_p11 }
  0x20   :  { %604 = shalt.err (!%p601_p1)
}
  0x21   :  { %25 = dma.hbm_to_vmem [thread:$0]  %s769_s1, 1024, %s668_s21, [#allocation3], %s633_s30, %s633_s30, %s634_s6  }
  0x22   :  { %s635_s18 = smov [#allocation6]   ;;  %s605_s23 = scalar_lea.hbm %s771_s3, 1024 }
  0x23   :  { %s43_s19 = sshll.u32 %s635_s18, 4  ;;  %p606_p2 = scmp.ne.s32.totalorder %s771_s3, %s605_s23  ;;  %s44_s19 = int_to_ptr.vmem [resolvable:$true] %s43_s19 }
  0x24   :  { %p609_p3 = scmp.lt.u32.totalorder %s605_s23, %s771_s3 }
  0x26   :  { %p611_p4 = pnand %p609_p3, %p606_p2 }
  0x28   :  { %614 = shalt.err (!%p611_p4)
}
  0x29   :  { %s615_s28 = scalar_lea.vmem %s44_s19, 1024  ;;  %p620_p6 = scmp.lt.s32.totalorder %s44_s19, %s44_s19 }
  0x2a   :  { %p616_p5 = scmp.ne.s32.totalorder %s44_s19, %s615_s28  ;;  %p621_p7 = scmp.lt.s32.totalorder %s615_s28, %s615_s28 }
  0x2c   :  { %p622_p8 = por %p621_p7, %p620_p6 }
  0x2e   :  { %p623_p9 = pnand %p622_p8, %p616_p5 }
  0x30   :  { %626 = shalt.err (!%p623_p9)
}
  0x31   :  { %49 = dma.hbm_to_vmem [thread:$0]  %s771_s3, 1024, %s44_s19, [#allocation5], %s633_s30, %s633_s30, %s634_s6  }
  0x32   :  { %627 = dma.done.wait [#allocation3], 1024  }
  0x33   :  { %628 = vsyncadd [#allocation3], 4294966272 }
  0x34   :  { %629 = dma.done.wait [#allocation5], 2048  }
  0x35   :  { %630 = vsyncadd [#allocation5], 4294965248  ;;  %v636_v0 = vmov 0.0   ;;  %vm637_vm0 = vmmov 0   ;;  %v536_v1 = vld [vmem:[#allocation2] sm:$0xff]   ;;  %v537_v2 = vld [vmem:[#allocation2 + $0x8] sm:$0xff]  }
  0x36   :  { %469 = vmatprep.subr.bf16.mxu0 %v636_v0  ;;  %485 = vmatprep.mubr.msk.bf16.mxu0 %vm637_vm0, %v636_v0  ;;  %v538_v3 = vld [vmem:[#allocation2 + $0x10] sm:$0xff]   ;;  %v545_v4 = vld [vmem:[#allocation4] sm:$0xff]   ;;  %v539_v5 = vld [vmem:[#allocation2 + $0x18] sm:$0xff]  }
  0x37   :  { %489 = vmatprep.subr.bf16.mxu1 %v636_v0  ;;  %505 = vmatprep.mubr.msk.bf16.mxu1 %vm637_vm0, %v636_v0  ;;  %v546_v6 = vld [vmem:[#allocation4 + $0x8] sm:$0xff]   ;;  %v540_v7 = vld [vmem:[#allocation2 + $0x20] sm:$0xff]   ;;  %v547_v8 = vld [vmem:[#allocation4 + $0x10] sm:$0xff]  }
  0x38   :  { %470 = vmatpush3.bf16.msra.mxu0 %v536_v1  ;;  %490 = vmatpush3.bf16.msra.mxu1 %v545_v4  ;;  %v541_v9 = vld [vmem:[#allocation2 + $0x28] sm:$0xff]   ;;  %v548_v10 = vld [vmem:[#allocation4 + $0x18] sm:$0xff]   ;;  %v542_v11 = vld [vmem:[#allocation2 + $0x30] sm:$0xff]  }
  0x39   :  { %471 = vmatprep.subr.bf16.mxu0 %v636_v0  ;;  %491 = vmatprep.subr.bf16.mxu1 %v636_v0  ;;  %v549_v12 = vld [vmem:[#allocation4 + $0x20] sm:$0xff]   ;;  %v543_v13 = vld [vmem:[#allocation2 + $0x38] sm:$0xff]   ;;  %v550_v14 = vld [vmem:[#allocation4 + $0x28] sm:$0xff]  }
  0x3a   :  { %v544_v15 = vld [vmem:[%s768_s0] sm:$0xff]   ;;  %v551_v16 = vld [vmem:[#allocation4 + $0x30] sm:$0xff]   ;;  %v552_v17 = vld [vmem:[#allocation4 + $0x38] sm:$0xff]  }
  0x3b   :  { %v553_v18 = vld [vmem:[#allocation6] sm:$0xff]   ;;  %v554_v19 = vld [vmem:[#allocation6 + $0x8] sm:$0xff]   ;;  %v555_v20 = vld [vmem:[#allocation6 + $0x10] sm:$0xff]  }
  0x3c   :  { %472 = vmatpush3.bf16.msra.mxu0 %v537_v2  ;;  %492 = vmatpush3.bf16.msra.mxu1 %v546_v6  ;;  %v556_v21 = vld [vmem:[#allocation6 + $0x18] sm:$0xff]   ;;  %v557_v22 = vld [vmem:[#allocation6 + $0x20] sm:$0xff]   ;;  %v558_v23 = vld [vmem:[#allocation6 + $0x28] sm:$0xff]  }
  0x3d   :  { %473 = vmatprep.subr.bf16.mxu0 %v636_v0  ;;  %493 = vmatprep.subr.bf16.mxu1 %v636_v0  ;;  %v414_v24 = vld [vmem:[%s772_s4] ss:$0 sm:$0xff]  ;;  %v559_v34 = vld [vmem:[#allocation6 + $0x30] sm:$0xff]   ;;  %v560_v35 = vld [vmem:[#allocation6 + $0x38] sm:$0xff]  }
  0x3e   :  { %v424_v36 = vld [vmem:[%s772_s4 + $0x1] ss:$0 sm:$0xff]  ;;  %v433_v46 = vld [vmem:[%s772_s4 + $0x2] ss:$0 sm:$0xff] }
  0x40   :  { %474 = vmatpush3.bf16.msra.mxu0 %v538_v3  ;;  %494 = vmatpush3.bf16.msra.mxu1 %v547_v8 }
  0x41   :  { %475 = vmatprep.subr.bf16.mxu0 %v636_v0  ;;  %495 = vmatprep.subr.bf16.mxu1 %v636_v0 }
  0x44   :  { %476 = vmatpush3.bf16.msra.mxu0 %v539_v5  ;;  %496 = vmatpush3.bf16.msra.mxu1 %v548_v10 }
  0x45   :  { %477 = vmatprep.subr.bf16.mxu0 %v636_v0  ;;  %497 = vmatprep.subr.bf16.mxu1 %v636_v0 }
  0x48   :  { %478 = vmatpush3.bf16.msra.mxu0 %v540_v7  ;;  %498 = vmatpush3.bf16.msra.mxu1 %v549_v12 }
  0x49   :  { %479 = vmatprep.subr.bf16.mxu0 %v636_v0  ;;  %499 = vmatprep.subr.bf16.mxu1 %v636_v0 }
  0x4c   :  { %480 = vmatpush3.bf16.msra.mxu0 %v541_v9  ;;  %500 = vmatpush3.bf16.msra.mxu1 %v550_v14 }
  0x4d   :  { %481 = vmatprep.subr.bf16.mxu0 %v636_v0  ;;  %501 = vmatprep.subr.bf16.mxu1 %v636_v0 }
  0x50   :  { %482 = vmatpush3.bf16.msra.mxu0 %v542_v11  ;;  %502 = vmatpush3.bf16.msra.mxu1 %v551_v16 }
  0x51   :  { %483 = vmatprep.subr.bf16.mxu0 %v636_v0  ;;  %503 = vmatprep.subr.bf16.mxu1 %v636_v0 }
  0x54   :  { %484 = vmatpush3.bf16.msra.mxu0 %v543_v13  ;;  %504 = vmatpush3.bf16.msra.mxu1 %v552_v17 }
  0x55   :  { %509 = vmatprep.subr.bf16.mxu0 %v636_v0 }
  0x57   :  { %486 = vmatmul.mubr.bf16.vlgmr.msra.gmra.mrb[0].mxu0 %v544_v15 }
  0x58   :  { %525 = vmatprep.mubr.msk.bf16.mxu0 %vm637_vm0, %v636_v0  ;;  %510 = vmatpush3.bf16.msra.mxu0 %v553_v18 }
  0x59   :  { %511 = vmatprep.subr.bf16.mxu0 %v636_v0 }
  0x5c   :  { %512 = vmatpush3.bf16.msra.mxu0 %v554_v19 }
  0x5d   :  { %513 = vmatprep.subr.bf16.mxu0 %v636_v0 }
  0x60   :  { %514 = vmatpush3.bf16.msra.mxu0 %v555_v20 }
  0x61   :  { %515 = vmatprep.subr.bf16.mxu0 %v636_v0 }
  0x64   :  { %516 = vmatpush3.bf16.msra.mxu0 %v556_v21 }
  0x65   :  { %517 = vmatprep.subr.bf16.mxu0 %v636_v0 }
  0x68   :  { %518 = vmatpush3.bf16.msra.mxu0 %v557_v22 }
  0x69   :  { %519 = vmatprep.subr.bf16.mxu0 %v636_v0 }
  0x6c   :  { %520 = vmatpush3.bf16.msra.mxu0 %v558_v23 }
  0x6d   :  { %521 = vmatprep.subr.bf16.mxu0 %v636_v0 }
  0x70   :  { %522 = vmatpush3.bf16.msra.mxu0 %v559_v34 }
  0x71   :  { %523 = vmatprep.subr.bf16.mxu0 %v636_v0 }
  0x74   :  { %524 = vmatpush3.bf16.msra.mxu0 %v560_v35 }
 0x12a   :  { %v173_v25 = vpop.f32.mrb[0].mxu0 }
 0x12b   :  { %v174_v26 = vadd.f32 %v414_v24, %v173_v25  ;;  %v487_v27 = vpop.f32.mrb[1].mxu0 }
 0x12c   :  { %v176_v28 = vpop.f32.mrb[2].mxu0 }
 0x12d   :  { %v177_v29 = vadd.f32 %v414_v24, %v176_v28  ;;  %v488_v30 = vpop.f32.mrb[3].mxu0  ;;  %v180_v31 = vmax.f32 %v174_v26, 0.0 }
 0x12f   :  { %v181_v32 = vmax.f32 %v177_v29, 0.0 }
 0x131   :  { %v182_v33 = vpack.c.bf16 %v181_v32, %v180_v31 }
 0x133   :  { %506 = vmatmul.mubr.bf16.vlgmr.msra.gmra.mrb[0].mxu1 %v182_v33 }
 0x206   :  { %v286_v37 = vpop.f32.mrb[0].mxu1 }
 0x207   :  { %v287_v38 = vadd.f32 %v424_v36, %v286_v37  ;;  %v507_v39 = vpop.f32.mrb[1].mxu1 }
 0x208   :  { %v289_v40 = vpop.f32.mrb[2].mxu1 }
 0x209   :  { %v290_v41 = vadd.f32 %v424_v36, %v289_v40  ;;  %v508_v42 = vpop.f32.mrb[3].mxu1  ;;  %v293_v43 = vmax.f32 %v287_v38, 0.0 }
 0x20b   :  { %v294_v44 = vmax.f32 %v290_v41, 0.0 }
 0x20d   :  { %v295_v45 = vpack.c.bf16 %v294_v44, %v293_v43 }
 0x20f   :  { %526 = vmatmul.mubr.bf16.vlgmr.msra.gmra.mrb[4].mxu0 %v295_v45 }
 0x2e2   :  { %v399_v47 = vpop.f32.mrb[4].mxu0 }
 0x2e3   :  { %v400_v48 = vadd.f32 %v433_v46, %v399_v47  ;;  %v527_v49 = vpop.f32.mrb[5].mxu0 }
 0x2e4   :  { %v402_v50 = vpop.f32.mrb[6].mxu0 }
 0x2e5   :  { %406 = vst [vmem:[%s773_s5] sm:$0xff] %v400_v48  ;;  %v403_v51 = vadd.f32 %v433_v46, %v402_v50  ;;  %v528_v52 = vpop.f32.mrb[7].mxu0 }
 0x2e7   :  { %407 = vst [vmem:[%s773_s5 + $0x8] sm:$0xff] %v403_v51 }
 0x2e8   :  { %412 = vsyncpa [#allocation3], 1 }
 0x2e9   :  { %413 = vsyncpa [#allocation5], 1 }

</bundles_post_ra>
